<compile_context>
chip_gen: v6e
topology: v6e:2x2x1
jax: 0.10.0
libtpu: 0.0.40
codegen_flags: <defaults>
</compile_context>

<pallas_src>
import functools

import jax
import jax.numpy as jnp
from jax.experimental import pallas as pl
from jax.experimental.pallas import tpu as pltpu


def _round_up(n, m):
    return ((n + m - 1) // m) * m


def _choose_tk(num_genes, dim1, max_tk=2048, tile_budget_bytes=8 << 20):
    """Contraction tile: multiple of 128, sized so one bf16 (tk, dim1) weight
    tile stays well under the per-buffer VMEM budget on every chip (v7x 64MiB)."""
    budget_tk = max(128, (tile_budget_bytes // (dim1 * 2)) // 128 * 128)
    return int(min(max_tk, budget_tk, _round_up(num_genes, 128)))


def _vmem_limit_bytes(batch, tk, d1, n_pad):
    """Per-buffer sizes x buffer count (default double-buffering) + scratch."""
    buffered = 0
    buffered += 2 * batch * tk * 2       # input tile (bf16), double-buffered
    buffered += 2 * tk * d1 * 2          # branch weight tile (bf16), double-buffered
    buffered += 2 * 3 * d1 * 4           # bias / gamma / beta rows
    buffered += 2 * d1 * n_pad * 2       # fused head weights (resident)
    buffered += 2 * n_pad * 4            # fused head bias
    buffered += 2 * batch * n_pad * 4    # output block (f32)
    resident = batch * d1 * 4            # f32 linear accumulator scratch
    need = buffered + resident + (8 << 20)   # headroom for compiler scratch
    return int(min(max(need, 32 << 20), 48 << 20))


def _siamatt_kernel(xy_ref, wm_ref, bm_ref, g_ref, be_ref, wh_ref, bh_ref,
                    out_ref, acc_ref):
    """One grid point = (branch, k-tile).

    xy_ref  : (B, tk)    bf16   input tile for this branch
    wm_ref  : (tk, D1)   bf16   Linear weight tile (pre-transposed to (in, out))
    bm_ref  : (1, D1)    f32    Linear bias (this branch)
    g_ref   : (1, D1)    f32    BatchNorm gamma (this branch)
    be_ref  : (1, D1)    f32    BatchNorm beta  (this branch)
    wh_ref  : (D1, NP)   bf16   fused [W_dom | W_cls] head, 128-padded (shared)
    bh_ref  : (1, NP)    f32    fused head bias (shared)
    out_ref : (B, NP)    f32    this branch's packed [domain | class] output
    acc_ref : (B, D1)    f32    pre-tanh Linear accumulator (scratch)
    """
    k = pl.program_id(1)

    @pl.when(k == 0)
    def _init():
        acc_ref[...] = jnp.zeros_like(acc_ref)

    # Streamed contraction over num_genes: bf16 MXU matmul, f32 accumulation.
    acc_ref[...] += jnp.dot(xy_ref[...], wm_ref[...],
                            preferred_element_type=jnp.float32)

    @pl.when(k == pl.num_programs(1) - 1)
    def _epilogue():
        eps = jnp.float32(1e-5)
        h = jnp.tanh(acc_ref[...] + bm_ref[...])            # f32 (EUP)
        # BatchNorm1d, training mode: batch mean + biased variance.
        mean = jnp.mean(h, axis=0, keepdims=True)
        hc = h - mean
        var = jnp.mean(hc * hc, axis=0, keepdims=True)
        hhat = hc * jax.lax.rsqrt(var + eps)                 # rsqrt -> EUP slot
        hb = (hhat * g_ref[...] + be_ref[...]).astype(jnp.bfloat16)   # (B, D1)
        # Fused heads: single lane-dense matmul + one unmasked f32 store slab.
        out_ref[...] = jnp.dot(hb, wh_ref[...],
                               preferred_element_type=jnp.float32) + bh_ref[...]


def init_siamatt_params(key, num_genes, label_num, dim1=768, dim2=32):
    """Parameters in PyTorch layout: Linear weights are (out_features, in_features)."""
    ks = jax.random.split(key, 8)

    def linear(kw, kb, fan_in, fan_out):
        bound = 1.0 / (fan_in ** 0.5)
        w = jax.random.uniform(kw, (fan_out, fan_in), jnp.float32, -bound, bound)
        b = jax.random.uniform(kb, (fan_out,), jnp.float32, -bound, bound)
        return w, b

    w_mod1, b_mod1 = linear(ks[0], ks[1], num_genes, dim1)
    w_mod2, b_mod2 = linear(ks[2], ks[3], num_genes, dim1)
    w_cls, b_cls = linear(ks[4], ks[5], dim1, label_num)
    w_dom, b_dom = linear(ks[6], ks[7], dim1, dim2)
    return dict(
        w_mod1=w_mod1, b_mod1=b_mod1, w_mod2=w_mod2, b_mod2=b_mod2,
        w_cls=w_cls, b_cls=b_cls, w_dom=w_dom, b_dom=b_dom,
        # Freshly constructed BatchNorm1d affine params.
        gamma1=jnp.ones((dim1,), jnp.float32), beta1=jnp.zeros((dim1,), jnp.float32),
        gamma2=jnp.ones((dim1,), jnp.float32), beta2=jnp.zeros((dim1,), jnp.float32),
    )


def pack_siamatt_params(params, *, tk=None):
    """One-time repack (hoisted off the hot path): transpose Linear weights to
    (in, out), cast to bf16, stack the two branches on a leading axis, pad the
    contraction to a tk multiple, and fuse+128-pad the [domain | class] head."""
    dim1, num_genes = params["w_mod1"].shape
    dim2 = params["w_dom"].shape[0]
    label_num = params["w_cls"].shape[0]
    if tk is None:
        tk = _choose_tk(num_genes, dim1)
    g_pad = _round_up(num_genes, tk)

    wm = jnp.stack([params["w_mod1"].T, params["w_mod2"].T])           # (2, G, D1)
    wm = jnp.pad(wm, ((0, 0), (0, g_pad - num_genes), (0, 0))).astype(jnp.bfloat16)
    bm = jnp.stack([params["b_mod1"], params["b_mod2"]]
                   ).reshape(2, 1, dim1).astype(jnp.float32)
    gamma = jnp.stack([params["gamma1"], params["gamma2"]]
                      ).reshape(2, 1, dim1).astype(jnp.float32)
    beta = jnp.stack([params["beta1"], params["beta2"]]
                     ).reshape(2, 1, dim1).astype(jnp.float32)

    n_heads = dim2 + label_num
    n_pad = _round_up(n_heads, 128)
    wh = jnp.concatenate([params["w_dom"].T, params["w_cls"].T], axis=1)  # (D1, nh)
    wh = jnp.pad(wh, ((0, 0), (0, n_pad - n_heads))).astype(jnp.bfloat16)
    bh = jnp.concatenate([params["b_dom"], params["b_cls"]])
    bh = jnp.pad(bh, (0, n_pad - n_heads)).reshape(1, n_pad).astype(jnp.float32)

    return dict(wm=wm, bm=bm, gamma=gamma, beta=beta, wh=wh, bh=bh)


@functools.partial(jax.jit, static_argnames=("dim2", "label_num", "tk"))
def siamatt_forward(packed, x, y, *, dim2, label_num, tk=None):
    """Returns (domain_x, domain_y, class_x, class_y), matching mode='train'."""
    batch, num_genes = x.shape
    _, g_pad, d1 = packed["wm"].shape
    n_pad = packed["wh"].shape[1]
    if tk is None:
        tk = _choose_tk(g_pad, d1)
    assert g_pad % tk == 0, (g_pad, tk)
    kt = g_pad // tk

    # Per-call input prep only: pad the contraction and stack the branches.
    xy = jnp.stack([x, y]).astype(jnp.bfloat16)                         # (2, B, G)
    if g_pad != num_genes:
        xy = jnp.pad(xy, ((0, 0), (0, 0), (0, g_pad - num_genes)))

    grid = (2, kt)   # (branch: parallel, contraction: arbitrary/last)
    in_specs = [
        pl.BlockSpec((None, batch, tk), lambda br, k: (br, 0, k)),      # xy tile
        pl.BlockSpec((None, tk, d1), lambda br, k: (br, k, 0)),         # weight tile
        pl.BlockSpec((None, 1, d1), lambda br, k: (br, 0, 0)),          # bias
        pl.BlockSpec((None, 1, d1), lambda br, k: (br, 0, 0)),          # gamma
        pl.BlockSpec((None, 1, d1), lambda br, k: (br, 0, 0)),          # beta
        pl.BlockSpec((d1, n_pad), lambda br, k: (0, 0)),                # head W (shared)
        pl.BlockSpec((1, n_pad), lambda br, k: (0, 0)),                 # head b (shared)
    ]
    out_specs = pl.BlockSpec((None, batch, n_pad), lambda br, k: (br, 0, 0))

    out = pl.pallas_call(
        _siamatt_kernel,
        out_shape=jax.ShapeDtypeStruct((2, batch, n_pad), jnp.float32),
        grid_spec=pltpu.PrefetchScalarGridSpec(
            num_scalar_prefetch=0,
            grid=grid,
            in_specs=in_specs,
            out_specs=out_specs,
            scratch_shapes=[pltpu.VMEM((batch, d1), jnp.float32)],      # linear acc
        ),
        compiler_params=pltpu.CompilerParams(
            dimension_semantics=("parallel", "arbitrary"),
            vmem_limit_bytes=_vmem_limit_bytes(batch, tk, d1, n_pad),
        ),
    )(xy, packed["wm"], packed["bm"], packed["gamma"], packed["beta"],
      packed["wh"], packed["bh"])

    out_x, out_y = out[0], out[1]
    domain_x = out_x[:, :dim2]
    domain_y = out_y[:, :dim2]
    class_x = out_x[:, dim2:dim2 + label_num]
    class_y = out_y[:, dim2:dim2 + label_num]
    return domain_x, domain_y, class_x, class_y


def siamatt_reference(params, x, y):
    """Pure-JAX f32 reference (mirrors the PyTorch forward in train mode)."""
    def branch(inp, w, b, g, beta):
        h = jnp.tanh(inp @ w.T + b)
        mean = h.mean(axis=0, keepdims=True)
        var = ((h - mean) ** 2).mean(axis=0, keepdims=True)   # biased variance
        return (h - mean) / jnp.sqrt(var + 1e-5) * g + beta

    hx = branch(x, params["w_mod1"], params["b_mod1"], params["gamma1"], params["beta1"])
    hy = branch(y, params["w_mod2"], params["b_mod2"], params["gamma2"], params["beta2"])
    class_x = hx @ params["w_cls"].T + params["b_cls"]
    class_y = hy @ params["w_cls"].T + params["b_cls"]
    domain_x = hx @ params["w_dom"].T + params["b_dom"]
    domain_y = hy @ params["w_dom"].T + params["b_dom"]
    return domain_x, domain_y, class_x, class_y


if __name__ == "__main__":
    # Small deterministic example consistent with the module's forward:
    # x, y: (batch, num_genes); SiamAtt(num_peaks, num_genes, label_num, dim1, dim2)
    batch, num_genes, label_num = 16, 512, 10
    dim1, dim2 = 256, 32
    tk = 128   # small on purpose so the K-tiled accumulate/epilogue path (kt=4) is exercised

    key = jax.random.PRNGKey(0)
    pkey, xkey, ykey = jax.random.split(key, 3)
    params = init_siamatt_params(pkey, num_genes, label_num, dim1=dim1, dim2=dim2)
    x = jax.random.normal(xkey, (batch, num_genes), jnp.float32)
    y = jax.random.normal(ykey, (batch, num_genes), jnp.float32)

    packed = pack_siamatt_params(params, tk=tk)            # one-time, off the hot path
    outs = siamatt_forward(packed, x, y, dim2=dim2, label_num=label_num, tk=tk)
    outs = jax.block_until_ready(outs)

    refs = siamatt_reference(params, x, y)
    names = ("domain_x", "domain_y", "class_x", "class_y")
    for name, got, ref in zip(names, outs, refs):
        assert got.shape == ref.shape, (name, got.shape, ref.shape)
        err = float(jnp.max(jnp.abs(got.astype(jnp.float32) - ref)))
        assert err < 5e-2, (name, err)   # bf16-matmul / f32-epilogue tolerance

    print("KERNEL_OK")
</pallas_src>

<mosaic_0001>
module attributes {stable_mosaic.version = 11 : i64} {
  func.func @_siamatt_kernel(%arg0: i32, %arg1: i32, %arg2: memref<1x16x128xbf16, #tpu.memory_space<vmem>>, %arg3: memref<1x128x256xbf16, #tpu.memory_space<vmem>>, %arg4: memref<1x1x256xf32, #tpu.memory_space<vmem>>, %arg5: memref<1x1x256xf32, #tpu.memory_space<vmem>>, %arg6: memref<1x1x256xf32, #tpu.memory_space<vmem>>, %arg7: memref<256x128xbf16, #tpu.memory_space<vmem>>, %arg8: memref<1x128xf32, #tpu.memory_space<vmem>>, %arg9: memref<1x16x128xf32, #tpu.memory_space<vmem>>, %arg10: memref<16x256xf32, #tpu.memory_space<vmem>>) attributes {dimension_semantics = [#tpu.dimension_semantics<parallel>, #tpu.dimension_semantics<arbitrary>], iteration_bounds = array<i64: 2, 4>, scalar_prefetch = 0 : i64, scratch_operands = 1 : i64, tpu.core_type = #tpu.core_type<tc>, window_params = [{transform_indices = @transform_0, window_bounds = array<i64: 1, 16, 128>}, {transform_indices = @transform_1, window_bounds = array<i64: 1, 128, 256>}, {transform_indices = @transform_2, window_bounds = array<i64: 1, 1, 256>}, {transform_indices = @transform_3, window_bounds = array<i64: 1, 1, 256>}, {transform_indices = @transform_4, window_bounds = array<i64: 1, 1, 256>}, {pipeline_mode = #tpu.pipeline_mode<synchronous>, transform_indices = @transform_5, window_bounds = array<i64: 256, 128>}, {pipeline_mode = #tpu.pipeline_mode<synchronous>, transform_indices = @transform_6, window_bounds = array<i64: 1, 128>}, {transform_indices = @transform_7, window_bounds = array<i64: 1, 16, 128>}]} {
    %c0_i32 = arith.constant 0 : i32
    %0 = arith.cmpi eq, %arg1, %c0_i32 : i32
    %1 = arith.extui %0 : i1 to i32
    %c0_i32_0 = arith.constant 0 : i32
    %2 = arith.cmpi ne, %1, %c0_i32_0 : i32
    scf.if %2 {
      %cst_11 = arith.constant 0.000000e+00 : f32
      %14 = vector.broadcast %cst_11 : f32 to vector<16x256xf32>
      %c0_12 = arith.constant 0 : index
      %c0_13 = arith.constant 0 : index
      %15 = vector.load %arg10[%c0_12, %c0_13] : memref<16x256xf32, #tpu.memory_space<vmem>>, vector<16x256xf32>
      tpu.vector_store %arg10[%c0_12, %c0_13], %14 {strides = array<i32>} : memref<16x256xf32, #tpu.memory_space<vmem>>, vector<16x256xf32>,
    } else {
    }
    %c0 = arith.constant 0 : index
    %c0_1 = arith.constant 0 : index
    %3 = vector.load %arg10[%c0, %c0_1] : memref<16x256xf32, #tpu.memory_space<vmem>>, vector<16x256xf32>
    %c0_2 = arith.constant 0 : index
    %c0_3 = arith.constant 0 : index
    %c0_4 = arith.constant 0 : index
    %4 = vector.load %arg2[%c0_2, %c0_3, %c0_4] : memref<1x16x128xbf16, #tpu.memory_space<vmem>>, vector<1x16x128xbf16>
    %5 = vector.shape_cast %4 : vector<1x16x128xbf16> to vector<16x128xbf16>
    %c0_5 = arith.constant 0 : index
    %c0_6 = arith.constant 0 : index
    %c0_7 = arith.constant 0 : index
    %6 = vector.load %arg3[%c0_5, %c0_6, %c0_7] : memref<1x128x256xbf16, #tpu.memory_space<vmem>>, vector<1x128x256xbf16>
    %7 = vector.shape_cast %6 : vector<1x128x256xbf16> to vector<128x256xbf16>
    %cst = arith.constant dense<0.000000e+00> : vector<16x256xf32>
    %8 = tpu.matmul %5, %7, %cst {dimension_numbers = #tpu.dot_dimension_numbers<[1], [0], [0], [1], [0, 0, 1, 1], [], []>} : vector<16x128xbf16>, vector<128x256xbf16>, vector<16x256xf32> -> vector<16x256xf32>
    %9 = arith.addf %3, %8 : vector<16x256xf32>
    %c0_8 = arith.constant 0 : index
    %c0_9 = arith.constant 0 : index
    %10 = vector.load %arg10[%c0_8, %c0_9] : memref<16x256xf32, #tpu.memory_space<vmem>>, vector<16x256xf32>
    tpu.vector_store %arg10[%c0_8, %c0_9], %9 {strides = array<i32>} : memref<16x256xf32, #tpu.memory_space<vmem>>, vector<16x256xf32>,
    %c3_i32 = arith.constant 3 : i32
    %11 = arith.cmpi eq, %arg1, %c3_i32 : i32
    %12 = arith.extui %11 : i1 to i32
    %c0_i32_10 = arith.constant 0 : i32
    %13 = arith.cmpi ne, %12, %c0_i32_10 : i32
    scf.if %13 {
      %c0_11 = arith.constant 0 : index
      %c0_12 = arith.constant 0 : index
      %14 = vector.load %arg10[%c0_11, %c0_12] : memref<16x256xf32, #tpu.memory_space<vmem>>, vector<16x256xf32>
      %c0_13 = arith.constant 0 : index
      %c0_14 = arith.constant 0 : index
      %c0_15 = arith.constant 0 : index
      %15 = vector.load %arg4[%c0_13, %c0_14, %c0_15] : memref<1x1x256xf32, #tpu.memory_space<vmem>>, vector<1x1x256xf32>
      %16 = vector.shape_cast %15 : vector<1x1x256xf32> to vector<1x256xf32>
      %17 = vector.broadcast %16 : vector<1x256xf32> to vector<16x256xf32>
      %18 = arith.addf %14, %17 : vector<16x256xf32>
      %19 = math.tanh %18 : vector<16x256xf32>
      %cst_16 = arith.constant dense<0.000000e+00> : vector<256xf32>
      %20 = vector.multi_reduction <add>, %19, %cst_16 [0] : vector<16x256xf32> to vector<256xf32>
      %21 = vector.shape_cast %20 : vector<256xf32> to vector<1x256xf32>
      %cst_17 = arith.constant 1.600000e+01 : f32
      %22 = vector.broadcast %cst_17 : f32 to vector<1x256xf32>
      %23 = arith.divf %21, %22 : vector<1x256xf32>
      %24 = vector.broadcast %23 : vector<1x256xf32> to vector<16x256xf32>
      %25 = arith.subf %19, %24 : vector<16x256xf32>
      %26 = arith.mulf %25, %25 : vector<16x256xf32>
      %cst_18 = arith.constant dense<0.000000e+00> : vector<256xf32>
      %27 = vector.multi_reduction <add>, %26, %cst_18 [0] : vector<16x256xf32> to vector<256xf32>
      %28 = vector.shape_cast %27 : vector<256xf32> to vector<1x256xf32>
      %cst_19 = arith.constant 1.600000e+01 : f32
      %29 = vector.broadcast %cst_19 : f32 to vector<1x256xf32>
      %30 = arith.divf %28, %29 : vector<1x256xf32>
      %cst_20 = arith.constant 9.99999974E-6 : f32
      %31 = vector.broadcast %cst_20 : f32 to vector<1x256xf32>
      %32 = arith.addf %30, %31 : vector<1x256xf32>
      %33 = math.rsqrt %32 : vector<1x256xf32>
      %34 = vector.broadcast %33 : vector<1x256xf32> to vector<16x256xf32>
      %35 = arith.mulf %25, %34 : vector<16x256xf32>
      %c0_21 = arith.constant 0 : index
      %c0_22 = arith.constant 0 : index
      %c0_23 = arith.constant 0 : index
      %36 = vector.load %arg5[%c0_21, %c0_22, %c0_23] : memref<1x1x256xf32, #tpu.memory_space<vmem>>, vector<1x1x256xf32>
      %37 = vector.shape_cast %36 : vector<1x1x256xf32> to vector<1x256xf32>
      %38 = vector.broadcast %37 : vector<1x256xf32> to vector<16x256xf32>
      %39 = arith.mulf %35, %38 : vector<16x256xf32>
      %c0_24 = arith.constant 0 : index
      %c0_25 = arith.constant 0 : index
      %c0_26 = arith.constant 0 : index
      %40 = vector.load %arg6[%c0_24, %c0_25, %c0_26] : memref<1x1x256xf32, #tpu.memory_space<vmem>>, vector<1x1x256xf32>
      %41 = vector.shape_cast %40 : vector<1x1x256xf32> to vector<1x256xf32>
      %42 = vector.broadcast %41 : vector<1x256xf32> to vector<16x256xf32>
      %43 = arith.addf %39, %42 : vector<16x256xf32>
      %44 = arith.truncf %43 : vector<16x256xf32> to vector<16x256xbf16>
      %c0_27 = arith.constant 0 : index
      %c0_28 = arith.constant 0 : index
      %45 = vector.load %arg7[%c0_27, %c0_28] : memref<256x128xbf16, #tpu.memory_space<vmem>>, vector<256x128xbf16>
      %cst_29 = arith.constant dense<0.000000e+00> : vector<16x128xf32>
      %46 = tpu.matmul %44, %45, %cst_29 {dimension_numbers = #tpu.dot_dimension_numbers<[1], [0], [0], [1], [0, 0, 1, 1], [], []>} : vector<16x256xbf16>, vector<256x128xbf16>, vector<16x128xf32> -> vector<16x128xf32>
      %c0_30 = arith.constant 0 : index
      %c0_31 = arith.constant 0 : index
      %47 = vector.load %arg8[%c0_30, %c0_31] : memref<1x128xf32, #tpu.memory_space<vmem>>, vector<1x128xf32>
      %48 = vector.broadcast %47 : vector<1x128xf32> to vector<16x128xf32>
      %49 = arith.addf %46, %48 : vector<16x128xf32>
      %c0_32 = arith.constant 0 : index
      %c0_33 = arith.constant 0 : index
      %c0_34 = arith.constant 0 : index
      %50 = vector.load %arg9[%c0_32, %c0_33, %c0_34] : memref<1x16x128xf32, #tpu.memory_space<vmem>>, vector<1x16x128xf32>
      %51 = vector.shape_cast %50 : vector<1x16x128xf32> to vector<16x128xf32>
      %52 = vector.shape_cast %49 : vector<16x128xf32> to vector<1x16x128xf32>
      tpu.vector_store %arg9[%c0_32, %c0_33, %c0_34], %52 {strides = array<i32>} : memref<1x16x128xf32, #tpu.memory_space<vmem>>, vector<1x16x128xf32>,
    } else {
    }
    return
  }
  func.func @transform_0(%arg0: i32, %arg1: i32) -> (i32, i32, i32) {
    %c0_i32 = arith.constant 0 : i32
    %c0_i32_0 = arith.constant 0 : i32
    return %arg0, %c0_i32, %arg1 : i32, i32, i32
  }
  func.func @transform_1(%arg0: i32, %arg1: i32) -> (i32, i32, i32) {
    %c0_i32 = arith.constant 0 : i32
    %c0_i32_0 = arith.constant 0 : i32
    return %arg0, %arg1, %c0_i32 : i32, i32, i32
  }
  func.func @transform_2(%arg0: i32, %arg1: i32) -> (i32, i32, i32) {
    %c0_i32 = arith.constant 0 : i32
    %c0_i32_0 = arith.constant 0 : i32
    %c0_i32_1 = arith.constant 0 : i32
    return %arg0, %c0_i32, %c0_i32_0 : i32, i32, i32
  }
  func.func @transform_3(%arg0: i32, %arg1: i32) -> (i32, i32, i32) {
    %c0_i32 = arith.constant 0 : i32
    %c0_i32_0 = arith.constant 0 : i32
    %c0_i32_1 = arith.constant 0 : i32
    return %arg0, %c0_i32, %c0_i32_0 : i32, i32, i32
  }
  func.func @transform_4(%arg0: i32, %arg1: i32) -> (i32, i32, i32) {
    %c0_i32 = arith.constant 0 : i32
    %c0_i32_0 = arith.constant 0 : i32
    %c0_i32_1 = arith.constant 0 : i32
    return %arg0, %c0_i32, %c0_i32_0 : i32, i32, i32
  }
  func.func @transform_5(%arg0: i32, %arg1: i32) -> (i32, i32) {
    %c0_i32 = arith.constant 0 : i32
    %c0_i32_0 = arith.constant 0 : i32
    %c0_i32_1 = arith.constant 0 : i32
    return %c0_i32, %c0_i32_0 : i32, i32
  }
  func.func @transform_6(%arg0: i32, %arg1: i32) -> (i32, i32) {
    %c0_i32 = arith.constant 0 : i32
    %c0_i32_0 = arith.constant 0 : i32
    %c0_i32_1 = arith.constant 0 : i32
    return %c0_i32, %c0_i32_0 : i32, i32
  }
  func.func @transform_7(%arg0: i32, %arg1: i32) -> (i32, i32, i32) {
    %c0_i32 = arith.constant 0 : i32
    %c0_i32_0 = arith.constant 0 : i32
    %c0_i32_1 = arith.constant 0 : i32
    return %arg0, %c0_i32, %c0_i32_0 : i32, i32, i32
  }
}

</mosaic_0001>

<bundles_post_ra>
// kernel: siamatt_forward.1
= control target key start
LH: loop header
LB: loop body
LE: loop exit
PB: predicated region body
PF: predicated region fallthrough
CT: control target
= control target key end

     0   :  { %s1615_s0 = inlined_call_operand.vmem [shape: bf16[2,16,512], index: 0, kind: input, shape index: {}]   ;;  %s1616_s1 = inlined_call_operand.hbm [shape: bf16[2,512,256], index: 1, kind: input, shape index: {}]   ;;  %s1617_s2 = inlined_call_operand.vmem [shape: f32[2,1,256], index: 2, kind: input, shape index: {}]   ;;  %s1618_s3 = inlined_call_operand.vmem [shape: f32[2,1,256], index: 3, kind: input, shape index: {}]   ;;  %s1619_s4 = inlined_call_operand.vmem [shape: f32[2,1,256], index: 4, kind: input, shape index: {}]   ;;  %s1620_s5 = inlined_call_operand.vmem [shape: bf16[256,128], index: 5, kind: input, shape index: {}]   ;;  %s1621_s6 = inlined_call_operand.vmem [shape: f32[1,128], index: 6, kind: input, shape index: {}]   ;;  %s1622_s7 = inlined_call_operand.vmem [shape: f32[2,16,128], index: 7, kind: output, shape index: {}]  }
   0x1   :  { %1626 = sst [smem:[#allocation11_spill]] %s1615_s0 }
   0x2   :  { %12 = vsyncpa [#allocation5], 0 }
   0x3   :  { %14 = vsyncpa [#allocation5 + $0x1], 0  ;;  %s1377_s24 = smov 0   ;;  %s1379_s25 = smov 0  }
   0x4   :  { %s1381_s26 = smov 0   ;;  %s1383_s27 = smov 0  }
   0x5   :  { %s1385_s28 = smov 0   ;;  %s1387_s29 = smov 0  }
   0x6   :  { %s1389_s30 = smov 0   ;;  %s1391_s8 = smov 0  }
   0x7 LB: > { %1627 = sst [smem:[#allocation7_spill]] %s1322_s29  ;;  %s29_s9 = sadd.s32 1, %s1322_s29  ;;  %s1330_s8 = sphi %s1391_s8, %s20_s8   ;;  %s1326_s30 = sphi %s1389_s30, %s1642_s30   ;;  %s1322_s29 = sphi %s1387_s29, %s1636_s29   ;;  %s1318_s28 = sphi %s1385_s28, %s1641_s28   ;;  %s1314_s27 = sphi %s1383_s27, %s1635_s27   ;;  %s1310_s26 = sphi %s1381_s26, %s1640_s26   ;;  %s1306_s25 = sphi %s1379_s25, %s1639_s25   ;;  %s1302_s24 = sphi %s1377_s24, %s1638_s24  }
   0x8   : > { %p30_p0 = scmp.ge.s32.totalorder %s29_s9, 4  ;;  %s32_s10 = sadd.s32 1, %s1326_s30 }
   0x9   : > { %s1033_s11 = sadd.s32 4294967295, %s1330_s8   ;;  %p48_p1 = scmp.ne.s32.totalorder %s1310_s26, %s1306_s25 }
   0xa   : > { %s1644_s9 = smov (%p30_p0, %s29_s9), 0  ;;  %s1646_s10 = smov (!%p30_p0, %s32_s10), %s1326_s30 }
   0xb   : > { %1628 = sst [smem:[#allocation8_spill]] %s1644_s9  ;;  %s37_s12 = ssub.s32 %s1322_s29, %s1644_s9 }
   0xc   : > { %p49_p2 = scmp.eq.s32.totalorder %s1330_s8, 0  ;;  %p34_p3 = scmp.ge.s32.totalorder %s1646_s10, 2 }
   0xd   : > { %p82_p4 = scmp.ne.s32.totalorder %s1306_s25, %s1302_s24  ;;  %p83_p6 = scmp.eq.s32.totalorder %s1033_s11, 0 }
   0xe   : > { %p1427_p5 = por %p49_p2, %p48_p1  ;;  %s1648_s10 = smov (%p34_p3, %s1646_s10), 0 }
   0xf   : > { %1630 = sst [smem:[#allocation9_spill]] %s1648_s10  ;;  %p1433_p7 = por %p83_p6, %p82_p4 }
  0x10   : > { %s36_s15 = ssub.s32 %s1326_s30, %s1648_s10  ;;  %s41_s17 = sadd.s32 1, %s1310_s26 }
  0x11   : > { %s38_s16 = sor.u32 %s37_s12, %s36_s15  ;;  %p1036_p9 = scmp.ge.s32.totalorder %s1330_s8, 8 }
  0x12   : > { %p39_p8 = scmp.eq.s32.totalorder %s38_s16, 0 }
  0x13   : > { %254 = sbr.rel (%p1036_p9) target bundleno = 52 (0x34), region = 24 }
  0x14   : > { %s1441_s18 = scalar_select %p39_p8, %s1310_s26, %s41_s17  }
  0x16   : > { %1632 = sst [smem:[#allocation10_spill]] %s1441_s18 }
  0x18   : > { %257 = sbr.rel (!%p1427_p5) target bundleno = 35 (0x23), region = 28  ;;  %s259_s19 = sand.u32 (%p1427_p5), 1, %s1310_s26  }
  0x19   : > { %s1038_s20 = sshll.u32 (%p1427_p5), %s1326_s30, 3  ;;  %s1037_s21 = sshll.u32 (%p1427_p5), %s259_s19, 3 }
  0x1a   : > { %s263_s22 = sadd.s32 (%p1427_p5), %s1322_s29, %s1038_s20  ;;  %s1633_s0 = sld [smem:[#allocation11_spill]] (%p1427_p5) }
  0x1b   : > { %s1039_s23 = sshll.u32 (%p1427_p5), %s263_s22, 2  ;;  %s261_s15 = scalar_lea.vmem (%p1427_p5), [#allocation3], %s1037_s21 }
  0x20   : > { %s265_s12 = scalar_lea.vmem %s1633_s0, %s1039_s23 }
  0x21   : > { %v282_v0 = vld [vmem:[%s265_s12] sm:$0xf]  ;;  %v284_v1 = vld [vmem:[%s265_s12 + $0x10] sm:$0xf] }
  0x22   : > { %283 = vst [vmem:[%s261_s15] sm:$0xf] %v282_v0  ;;  %285 = vst [vmem:[%s261_s15 + $0x4] sm:$0xf] %v284_v1 }
  0x23 PF: > { %s314_s16 = sand.u32 1, %s1310_s26   ;;  %s1091_s17 = sshll.u32 %s1322_s29, 5 }
  0x24   : > { %s1040_s10 = sshll.u32 %s314_s16, 7  ;;  %s1043_s19 = sshll.u32 %s1326_s30, 7 }
  0x25   : > { %s325_s20 = sadd.s32 %s1091_s17, %s1043_s19  ;;  %s318_s22 = scalar_lea.vmem [#allocation4], %s1040_s10 }
  0x26   : > { %s328_s9 = sshll.u32 %s318_s22, 4  ;;  %s1044_s18 = sshll.u32 %s325_s20, 6  ;;  %s329_s9 = int_to_ptr.vmem [resolvable:$true] %s328_s9 }
  0x27   : > { %s327_s21 = scalar_lea.hbm %s1616_s1, %s1044_s18  ;;  %s315_s11 = scalar_lea.sflag [#allocation5], %s314_s16 }
  0x28   : > { %s1250_s12 = scalar_lea.vmem %s329_s9, 2048  ;;  %s1332_s15 = smov [#allocation4]  }
  0x29   : > { %p1251_p10 = scmp.ne.s32.totalorder %s329_s9, %s1250_s12  ;;  %s1254_s0 = sshll.u32 %s1332_s15, 4  ;;  %s1255_s0 = int_to_ptr.vmem [resolvable:$false] %s1254_s0 }
  0x2a   : > { %s1256_s29 = scalar_lea.vmem %s1255_s0, 4096  ;;  %p1257_p13 = scmp.lt.s32.totalorder %s329_s9, %s1255_s0 }
  0x2b   : > { %p1252_p11 = pnand %p1251_p10, %p1427_p5  ;;  %p1258_p0 = scmp.lt.s32.totalorder %s1256_s29, %s1250_s12 }
  0x2d   : > { %p1253_p12 = pneg %p1252_p11  ;;  %p1259_p1 = por %p1258_p0, %p1257_p13 }
  0x2f   : > { %p1260_p2 = pnand %p1259_p1, %p1253_p12 }
  0x31   : > { %1263 = shalt.err (!%p1260_p2)
}
  0x32   : > { %s1333_s10 = smov 128   ;;  %s1334_s17 = smov 8  }
  0x33   : > { %1115 = dma.hbm_to_vmem [thread:$0]  (%p1427_p5), %s327_s21, 2048, %s329_s9, %s315_s11, %s1333_s10, %s1333_s10, %s1334_s17  }
  0x34 PF: > { %p1045_p3 = scmp.ge.s32.totalorder %s1330_s8, 1  ;;  %p357_p4 = scmp.lt.s32.totalorder %s1330_s8, 9 }
  0x36   : > { %p358_p6 = pnand %p1045_p3, %p357_p4 }
  0x37   : > { %s364_s18 = sand.u32 (!%p358_p6), 1, %s1306_s25  }
  0x38   : > { %361 = sbr.rel (%p358_p6) target bundleno = 599 (0x257), region = 85  ;;  %s1046_s0 = sshll.u32 (!%p358_p6), %s364_s18, 3 }
  0x39   : > { %s1047_s29 = sshll.u32 (!%p358_p6), %s364_s18, 7  ;;  %s1465_s16 = scalar_lea.vmem (!%p358_p6), [#allocation3], %s1046_s0 }
  0x3a   : > { %s371_s19 = scalar_lea.sflag (!%p358_p6), [#allocation5], %s364_s18  ;;  %s1467_s20 = scalar_lea.vmem (!%p358_p6), [#allocation4], %s1047_s29 }
  0x3d   : > { %1297 = dma.done.wait (%p1433_p7), %s371_s19, 2048  }
  0x3e   : > { %1299 = vsyncadd (%p1433_p7), %s371_s19, 4294965248  ;;  %p422_p5 = scmp.lt.s32.totalorder %s1318_s28, 1  ;;  %p1053_p7 = scmp.ne.s32.totalorder %s1314_s27, 0 }
  0x40   : > { %s1650_s28 = smov (!%p422_p5, %s1318_s28), 1  ;;  %443 = sbr.rel (%p1053_p7) target bundleno = 72 (0x48), region = 97 }
  0x41   : > { %s1475_s9 = sshll.u32 %s1650_s28, 1  ;;  %s1092_s13 = sshll.u32 %s1650_s28, 4 }
  0x42   : > { %s425_s24 = scalar_lea.vmem %s1617_s2, %s1475_s9  ;;  %s429_s12 = scalar_lea.vmem %s1618_s3, %s1475_s9 }
  0x43   : > { %s433_s10 = scalar_lea.vmem %s1619_s4, %s1475_s9  ;;  %s1492_s0 = scalar_lea.vmem %s1622_s7, %s1092_s13 }
  0x45   : > { %v1335_v2 = vmov 0.0  }
  0x46   : > { %444 = vst [vmem:[#allocation2 + $0x10] sm:$0xff] %v1335_v2  ;;  %445 = vst [vmem:[#allocation2] sm:$0xff] %v1335_v2 }
  0x47   : > { %446 = vst [vmem:[#allocation2 + $0x18] sm:$0xff] %v1335_v2  ;;  %447 = vst [vmem:[#allocation2 + $0x8] sm:$0xff] %v1335_v2 }
  0x48 PF: > { %v1185_v3 = vld [vmem:[%s1467_s20 + $0x74] ss:$8 sps:$4 sm:$0xff]   ;;  %v1187_v4 = vld [vmem:[%s1467_s20 + $0x70] ss:$8 sps:$4 sm:$0xff]   ;;  %v1336_v5 = vmov 0   ;;  %p1071_p8 = scmp.ne.s32.totalorder %s1314_s27, 3 }
  0x49   : > { %588 = vmatprep.mubr.bf16.mxu0 %v1336_v5  ;;  %556 = vmatprep.subr.bf16.mxu0 %v1185_v3  ;;  %v1188_v6 = vld [vmem:[%s1467_s20 + $0x64] ss:$8 sps:$4 sm:$0xff]   ;;  %v1190_v7 = vld [vmem:[%s1467_s20 + $0x60] ss:$8 sps:$4 sm:$0xff]   ;;  %v1191_v8 = vld [vmem:[%s1467_s20 + $0x54] ss:$8 sps:$4 sm:$0xff]  }
  0x4a   : > { %557 = vmatpush1.bf16.msra.mxu0 %v1187_v4  ;;  %v1193_v9 = vld [vmem:[%s1467_s20 + $0x50] ss:$8 sps:$4 sm:$0xff]   ;;  %v1194_v10 = vld [vmem:[%s1467_s20 + $0x44] ss:$8 sps:$4 sm:$0xff]   ;;  %v1196_v11 = vld [vmem:[%s1467_s20 + $0x40] ss:$8 sps:$4 sm:$0xff]  }
  0x4b   : > { %558 = vmatprep.subr.bf16.mxu0 %v1188_v6  ;;  %v1197_v12 = vld [vmem:[%s1467_s20 + $0x34] ss:$8 sps:$4 sm:$0xff]   ;;  %v1199_v13 = vld [vmem:[%s1467_s20 + $0x30] ss:$8 sps:$4 sm:$0xff]   ;;  %v1200_v14 = vld [vmem:[%s1467_s20 + $0x24] ss:$8 sps:$4 sm:$0xff]  }
  0x4c   : > { %v1202_v15 = vld [vmem:[%s1467_s20 + $0x20] ss:$8 sps:$4 sm:$0xff]   ;;  %v1203_v16 = vld [vmem:[%s1467_s20 + $0x14] ss:$8 sps:$4 sm:$0xff]   ;;  %v1205_v17 = vld [vmem:[%s1467_s20 + $0x10] ss:$8 sps:$4 sm:$0xff]  }
  0x4d   : > { %v1206_v18 = vld [vmem:[%s1467_s20 + $0x4] ss:$8 sps:$4 sm:$0xff]   ;;  %v1208_v19 = vld [vmem:[%s1467_s20] ss:$8 sps:$4 sm:$0xff]   ;;  %v1209_v20 = vld [vmem:[%s1465_s16] sm:$0xff]  }
  0x4e   : > { %559 = vmatpush1.bf16.msra.mxu0 %v1190_v7  ;;  %v448_v21 = vld [vmem:[#allocation2 + $0x10] sm:$0xff]  ;;  %v449_v23 = vld [vmem:[#allocation2] sm:$0xff]  ;;  %v450_v26 = vld [vmem:[#allocation2 + $0x18] sm:$0xff] }
  0x4f   : > { %560 = vmatprep.subr.bf16.mxu0 %v1191_v8  ;;  %v451_v29 = vld [vmem:[#allocation2 + $0x8] sm:$0xff] }
  0x52   : > { %561 = vmatpush1.bf16.msra.mxu0 %v1193_v9 }
  0x53   : > { %562 = vmatprep.subr.bf16.mxu0 %v1194_v10 }
  0x56   : > { %563 = vmatpush1.bf16.msra.mxu0 %v1196_v11 }
  0x57   : > { %564 = vmatprep.subr.bf16.mxu0 %v1197_v12 }
  0x5a   : > { %565 = vmatpush1.bf16.msra.mxu0 %v1199_v13 }
  0x5b   : > { %566 = vmatprep.subr.bf16.mxu0 %v1200_v14 }
  0x5e   : > { %567 = vmatpush1.bf16.msra.mxu0 %v1202_v15 }
  0x5f   : > { %568 = vmatprep.subr.bf16.mxu0 %v1203_v16 }
  0x62   : > { %569 = vmatpush1.bf16.msra.mxu0 %v1205_v17 }
  0x63   : > { %570 = vmatprep.subr.bf16.mxu0 %v1206_v18 }
  0x66   : > { %571 = vmatpush1.bf16.msra.mxu0 %v1208_v19 }
  0x69   : > { %589 = vmatmul.mubr.bf16.vlgmr.msra.gmra.mxu0 %v1209_v20 }
 0x129   : > { %v590_v22 = vpop.f32.mrf.mxu0 }
 0x12a   : > { %v599_v24 = vadd.f32 %v590_v22, %v448_v21 }
 0x12b   : > { %v592_v25 = vpop.f32.mrf.mxu0 }
 0x12c   : > { %603 = vst [vmem:[#allocation2 + $0x10] sm:$0xff] %v599_v24  ;;  %v600_v27 = vadd.f32 %v592_v25, %v449_v23 }
 0x12d   : > { %v594_v28 = vpop.f32.mrf.mxu0 }
 0x12e   : > { %604 = vst [vmem:[#allocation2] sm:$0xff] %v600_v27  ;;  %v601_v30 = vadd.f32 %v594_v28, %v450_v26  ;;  %610 = sbr.rel (%p1071_p8) target bundleno = 599 (0x257), region = 101 }
 0x12f   : > { %v596_v31 = vpop.f32.mrf.mxu0 }
 0x130   : > { %605 = vst [vmem:[#allocation2 + $0x18] sm:$0xff] %v601_v30  ;;  %v602_v32 = vadd.f32 %v596_v31, %v451_v29 }
 0x132   : > { %606 = vst [vmem:[#allocation2 + $0x8] sm:$0xff] %v602_v32 }
 0x133   : > { %v1210_v33 = vld [vmem:[%s1620_s5 + $0x78] sm:$0xff]   ;;  %v1212_v35 = vld [vmem:[%s1620_s5 + $0x70] sm:$0xff]   ;;  %v1214_v37 = vld [vmem:[%s1620_s5 + $0x68] sm:$0xff]   ;;  %v617_v38 = vlaneseq }
 0x134   : > { %v1211_v34 = vld [vmem:[%s1620_s5 + $0x38] sm:$0xff]   ;;  %1093 = vmatprep.subr.bf16.mxu0 %v1210_v33  ;;  %v1213_v36 = vld [vmem:[%s1620_s5 + $0x30] sm:$0xff]   ;;  %v1215_v39 = vld [vmem:[%s1620_s5 + $0x28] sm:$0xff]  }
 0x135   : > { %1094 = vmatpush3.bf16.msra.mxu0 %v1211_v34  ;;  %v1216_v40 = vld [vmem:[%s1620_s5 + $0x60] sm:$0xff]   ;;  %v618_v41 = vshrl.u32 %v617_v38, 7  ;;  %v1218_v43 = vld [vmem:[%s1620_s5 + $0x58] sm:$0xff]   ;;  %v1220_v47 = vld [vmem:[%s1620_s5 + $0x50] sm:$0xff]  }
 0x136   : > { %1095 = vmatprep.subr.bf16.mxu0 %v1212_v35  ;;  %v1217_v42 = vld [vmem:[%s1620_s5 + $0x20] sm:$0xff]   ;;  %v1219_v46 = vld [vmem:[%s1620_s5 + $0x18] sm:$0xff]   ;;  %v611_v48 = vld [vmem:[#allocation2 + $0x10] sm:$0xff] }
 0x137   : > { %v1540_v44 = vsub.s32 0, %v618_v41  ;;  %v1542_v45 = vsub.s32 1, %v618_v41  ;;  %v612_v49 = vld [vmem:[#allocation2] sm:$0xff]  ;;  %v613_v50 = vld [vmem:[#allocation2 + $0x18] sm:$0xff]  ;;  %v1221_v55 = vld [vmem:[%s1620_s5 + $0x10] sm:$0xff]  }
 0x138   : > { %v615_v51 = vld [vmem:[%s425_s24] sm:$0x3]  ;;  %v1222_v56 = vld [vmem:[%s1620_s5 + $0x48] sm:$0xff]  }
 0x139   : > { %1096 = vmatpush3.bf16.msra.mxu0 %v1213_v36  ;;  %v614_v52 = vld [vmem:[#allocation2 + $0x8] sm:$0xff]  ;;  %v620_v53 = vrot.slane %v615_v51, %v1540_v44  ;;  %v624_v54 = vrot.slane %v615_v51, %v1542_v45  ;;  %v1224_v62 = vld [vmem:[%s1620_s5 + $0x40] sm:$0xff]  }
 0x13a   : > { %1097 = vmatprep.subr.bf16.mxu0 %v1214_v37  ;;  %v1223_v61 = vld [vmem:[%s1620_s5 + $0x8] sm:$0xff]   ;;  %v1225_v63 = vld [vmem:[%s1620_s5] sm:$0xff]  }
 0x13b   : > { %v627_v57 = vadd.f32 %v620_v53, %v611_v48  ;;  %v628_v58 = vadd.f32 %v624_v54, %v612_v49  ;;  %v629_v59 = vadd.f32 %v620_v53, %v613_v50  ;;  %v630_v60 = vadd.f32 %v624_v54, %v614_v52  ;;  %v684_v48 = vld [vmem:[%s429_s12] sm:$0x3] }
 0x13c   : > { %v700_v49 = vld [vmem:[%s433_s10] sm:$0x3]  ;;  %v689_v50 = vrot.slane %v684_v48, %v1540_v44  ;;  %v693_v52 = vrot.slane %v684_v48, %v1542_v45 }
 0x13d   : > { %1098 = vmatpush3.bf16.msra.mxu0 %v1215_v39  ;;  %1226 = vtanh.f32 %v627_v57  ;;  %v705_v54 = vrot.slane %v700_v49, %v1540_v44 }
 0x13e   : > { %1099 = vmatprep.subr.bf16.mxu0 %v1216_v40  ;;  %1228 = vtanh.f32 %v628_v58 }
 0x13f   : > { %1230 = vtanh.f32 %v629_v59  ;;  %v709_v59 = vrot.slane %v700_v49, %v1542_v45 }
 0x140   : > { %1232 = vtanh.f32 %v630_v60 }
 0x141   : > { %1100 = vmatpush3.bf16.msra.mxu0 %v1217_v42 }
 0x142   : > { %1101 = vmatprep.subr.bf16.mxu0 %v1218_v43 }
 0x145   : > { %1102 = vmatpush3.bf16.msra.mxu0 %v1219_v46 }
 0x146   : > { %1103 = vmatprep.subr.bf16.mxu0 %v1220_v47 }
 0x149   : > { %1104 = vmatpush3.bf16.msra.mxu0 %v1221_v55 }
 0x14a   : > { %1105 = vmatprep.subr.bf16.mxu0 %v1222_v56  ;;  %v1227_v0 = vpop.eup %1226 }
 0x14b   : > { %v1229_v1 = vpop.eup %1228 }
 0x14c   : > { %v1231_v2 = vpop.eup %1230 }
 0x14d   : > { %1106 = vmatpush3.bf16.msra.mxu0 %v1223_v61  ;;  %v1233_v3 = vpop.eup %1232  ;;  %v635_v4 = vadd.f32 %v1231_v2, %v1227_v0 }
 0x14e   : > { %1107 = vmatprep.subr.bf16.mxu0 %v1224_v62  ;;  %v642_v5 = vadd.f32 %v1233_v3, %v1229_v1 }
 0x14f   : > { %v636_v6 = vrot.slane %v635_v4, 4 }
 0x150   : > { %v643_v7 = vrot.slane %v642_v5, 4 }
 0x151   : > { %1108 = vmatpush3.bf16.msra.mxu0 %v1225_v63  ;;  %v637_v8 = vadd.f32 %v636_v6, %v635_v4  ;;  %v1072_v6 = vld [vmem:[%s1621_s6] ss:$0 sm:$0xff] }
 0x152   : > { %v644_v9 = vadd.f32 %v643_v7, %v642_v5 }
 0x153   : > { %v638_v10 = vrot.slane %v637_v8, 2 }
 0x154   : > { %v645_v11 = vrot.slane %v644_v9, 2 }
 0x155   : > { %v639_v12 = vadd.f32 %v638_v10, %v637_v8 }
 0x156   : > { %v646_v13 = vadd.f32 %v645_v11, %v644_v9 }
 0x157   : > { %v640_v14 = vrot.slane %v639_v12, 1 }
 0x158   : > { %v647_v15 = vrot.slane %v646_v13, 1 }
 0x159   : > { %v641_v16 = vadd.f32 %v640_v14, %v639_v12 }
 0x15a   : > { %v648_v17 = vadd.f32 %v647_v15, %v646_v13 }
 0x15b   : > { %v650_v18 = vmul.f32 0.0625, %v641_v16 }
 0x15c   : > { %v651_v19 = vmul.f32 0.0625, %v648_v17 }
 0x15d   : > { %v652_v20 = vsub.f32 %v1227_v0, %v650_v18  ;;  %v654_v21 = vsub.f32 %v1231_v2, %v650_v18 }
 0x15e   : > { %v653_v22 = vsub.f32 %v1229_v1, %v651_v19  ;;  %v655_v23 = vsub.f32 %v1233_v3, %v651_v19 }
 0x15f   : > { %v656_v24 = vmul.f32 %v652_v20, %v652_v20  ;;  %v658_v25 = vmul.f32 %v654_v21, %v654_v21 }
 0x160   : > { %v657_v26 = vmul.f32 %v653_v22, %v653_v22  ;;  %v659_v27 = vmul.f32 %v655_v23, %v655_v23 }
 0x161   : > { %v660_v28 = vadd.f32 %v658_v25, %v656_v24 }
 0x162   : > { %v667_v29 = vadd.f32 %v659_v27, %v657_v26 }
 0x163   : > { %v661_v30 = vrot.slane %v660_v28, 4 }
 0x164   : > { %v668_v31 = vrot.slane %v667_v29, 4 }
 0x165   : > { %v662_v32 = vadd.f32 %v661_v30, %v660_v28 }
 0x166   : > { %v669_v33 = vadd.f32 %v668_v31, %v667_v29 }
 0x167   : > { %v663_v34 = vrot.slane %v662_v32, 2 }
 0x168   : > { %v670_v35 = vrot.slane %v669_v33, 2 }
 0x169   : > { %v664_v36 = vadd.f32 %v663_v34, %v662_v32 }
 0x16a   : > { %v671_v37 = vadd.f32 %v670_v35, %v669_v33 }
 0x16b   : > { %v665_v38 = vrot.slane %v664_v36, 1 }
 0x16c   : > { %v672_v39 = vrot.slane %v671_v37, 1 }
 0x16d   : > { %v666_v40 = vadd.f32 %v665_v38, %v664_v36 }
 0x16e   : > { %v673_v41 = vadd.f32 %v672_v39, %v671_v37 }
 0x16f   : > { %v674_v42 = vmul.f32 0.0625, %v666_v40 }
 0x170   : > { %v675_v43 = vmul.f32 0.0625, %v673_v41 }
 0x171   : > { %v676_v46 = vadd.f32 1e-05, %v674_v42 }
 0x172   : > { %v677_v47 = vadd.f32 1e-05, %v675_v43 }
 0x173   : > { %1234 = vrsqrt.f32 %v676_v46 }
 0x174   : > { %1236 = vrsqrt.f32 %v677_v47 }
 0x180   : > { %v1235_v51 = vpop.eup %1234 }
 0x181   : > { %v1237_v53 = vpop.eup %1236  ;;  %v680_v55 = vmul.f32 %v1235_v51, %v652_v20  ;;  %v682_v56 = vmul.f32 %v1235_v51, %v654_v21 }
 0x182   : > { %v681_v57 = vmul.f32 %v1237_v53, %v653_v22  ;;  %v683_v58 = vmul.f32 %v1237_v53, %v655_v23 }
 0x183   : > { %v696_v60 = vmul.f32 %v689_v50, %v680_v55  ;;  %v698_v61 = vmul.f32 %v689_v50, %v682_v56 }
 0x184   : > { %v697_v62 = vmul.f32 %v693_v52, %v681_v57  ;;  %v699_v63 = vmul.f32 %v693_v52, %v683_v58 }
 0x185   : > { %v712_v0 = vadd.f32 %v705_v54, %v696_v60  ;;  %v714_v1 = vadd.f32 %v705_v54, %v698_v61 }
 0x186   : > { %v713_v2 = vadd.f32 %v709_v59, %v697_v62  ;;  %v715_v3 = vadd.f32 %v709_v59, %v699_v63 }
 0x187   : > { %v716_v4 = vpack.c.bf16 %v714_v1, %v712_v0 }
 0x188   : > { %v717_v5 = vpack.c.bf16 %v715_v3, %v713_v2 }
 0x18a   : > { %885 = vmatprep.mubr.bf16.mxu0 %v717_v5 }
 0x18b   : > { %886 = vmatmul.mubr.bf16.vlgmr.msra.gmra.mxu0 %v716_v4 }
 0x24b   : > { %v1109_v44 = vpop.f32.mrf.mxu0 }
 0x24d   : > { %v1110_v45 = vpop.f32.mrf.mxu0 }
 0x24e   : > { %v1111_v7 = vadd.f32 %v1110_v45, %v1109_v44 }
 0x24f   : > { %v1112_v8 = vpop.f32.mrf.mxu0 }
 0x250   : > { %v888_v9 = vadd.f32 %v1111_v7, %v1072_v6 }
 0x251   : > { %v1113_v10 = vpop.f32.mrf.mxu0 }
 0x252   : > { %894 = vst [vmem:[%s1492_s0] sm:$0xff] %v888_v9  ;;  %v1114_v11 = vadd.f32 %v1113_v10, %v1112_v8 }
 0x254   : > { %v891_v12 = vadd.f32 %v1114_v11, %v1072_v6 }
 0x256   : > { %895 = vst [vmem:[%s1492_s0 + $0x8] sm:$0xff] %v891_v12 }
 0x257 PF: > { %s20_s8 = sadd.s32 1, %s1330_s8   ;;  %s1634_s10 = sld [smem:[#allocation10_spill]] }
 0x258   : > { %p17_p9 = scmp.ge.s32.totalorder %s20_s8, 10   ;;  %s1635_s27 = sld [smem:[#allocation7_spill]] }
 0x259   : > { %s1636_s29 = sld [smem:[#allocation8_spill]]  ;;  %s1638_s24 = smov %s1306_s25 }
 0x25a   : > { %s1637_s23 = sld [smem:[#allocation9_spill]]  ;;  %s1639_s25 = smov %s1310_s26 }
 0x25b   : > { %s1641_s28 = smov %s1326_s30 }
 0x25c   :  { %19 = sbr.rel (!%p17_p9) target bundleno = 7 (0x7), region = 154 }
 0x25d   : > { %s1640_s26 = smov %s1634_s10 }
 0x260   : > { %s1642_s30 = smov %s1637_s23 }
 0x261   :  { %917 = vsyncpa [#allocation5], 1 }
 0x262   :  { %919 = vsyncpa [#allocation5 + $0x1], 1 }

</bundles_post_ra>
